<compile_context>
chip_gen: v7x
topology: tpu7x:2x2x1
jax: 0.10.0
libtpu: 0.0.40
codegen_flags: <defaults>
</compile_context>

<pallas_src>
import functools
import math
from typing import NamedTuple

import jax
import jax.numpy as jnp
from jax.experimental import pallas as pl
from jax.experimental.pallas import tpu as pltpu


# ------------------------------ small helpers ------------------------------ #
def _round_up(x: int, m: int) -> int:
    return ((x + m - 1) // m) * m


def _sublane_pack(dtype) -> int:
    """Sublane packing factor: 8 for 32-bit, 16 for 16-bit, 32 for 8-bit dtypes."""
    bits = jnp.dtype(dtype).itemsize * 8
    return max(8, 256 // bits)


def _divisor_tile(padded_dim: int, pref: int) -> int:
    """Largest 128-multiple tile that divides `padded_dim` (a 128-multiple) and is <= pref."""
    q = padded_dim // 128
    best = 128
    for d in range(1, q + 1):
        if q % d == 0 and 128 * d <= pref:
            best = 128 * d
    return best


# ----------------------------- Pallas kernels ------------------------------ #
def _silly_linear_kernel_acc(x_ref, wt_ref, b_ref, o_ref, acc_ref, *, compute_dtype):
    """Variant with f32 VMEM accumulator (used when the output dtype is narrower than f32)."""
    k = pl.program_id(2)

    @pl.when(k == 0)
    def _init():
        acc_ref[...] = jnp.zeros_like(acc_ref)

    acc_ref[...] += jnp.dot(
        x_ref[...].astype(compute_dtype), wt_ref[...],
        preferred_element_type=jnp.float32,
    )

    @pl.when(k == pl.num_programs(2) - 1)
    def _finalize():
        o_ref[...] = (acc_ref[...] + b_ref[...]).astype(o_ref.dtype)


def _silly_linear_kernel_f32out(x_ref, wt_ref, b_ref, o_ref, *, compute_dtype):
    """Variant accumulating directly into the resident f32 output block (no scratch)."""
    k = pl.program_id(2)

    @pl.when(k == 0)
    def _init():
        o_ref[...] = jnp.zeros_like(o_ref)

    o_ref[...] += jnp.dot(
        x_ref[...].astype(compute_dtype), wt_ref[...],
        preferred_element_type=jnp.float32,
    )

    @pl.when(k == pl.num_programs(2) - 1)
    def _finalize():
        o_ref[...] = o_ref[...] + b_ref[...]


# ------------------------- prepared (padded) params ------------------------ #
class SillyLinearParams(NamedTuple):
    wt: jax.Array          # (K_pad, N_pad) pre-transposed, zero-padded, compute dtype
    bias: jax.Array        # (1, N_pad) float32, zero-padded
    in_features: int
    out_features: int
    tk: int
    tn: int


def prepare_silly_linear_params(weight, bias, *, compute_dtype=jnp.bfloat16,
                                tn_pref=512, tk_pref=1024) -> SillyLinearParams:
    """One-time prep: transpose W to (in, out), zero-pad to 128-multiples, cast to compute
    dtype (bf16 by default -> half the weight HBM bytes, full-rate bf16 MXU)."""
    out_f, in_f = weight.shape
    k_pad = _round_up(in_f, 128)
    n_pad = _round_up(out_f, 128)
    tk = _divisor_tile(k_pad, tk_pref)   # K tile: lane dim of x, sublane dim of W^T
    tn = _divisor_tile(n_pad, tn_pref)   # N tile: lane dim of W^T / bias / output
    wt = jnp.pad(weight.T.astype(compute_dtype), ((0, k_pad - in_f), (0, n_pad - out_f)))
    b2 = jnp.pad(bias.astype(jnp.float32), (0, n_pad - out_f)).reshape(1, n_pad)
    return SillyLinearParams(wt=wt, bias=b2, in_features=in_f,
                             out_features=out_f, tk=tk, tn=tn)


# ------------------------------ forward pass -------------------------------- #
def silly_linear_forward(x, params: SillyLinearParams, *, tm_pref=512, wt_buffers=2):
    """F.linear(x, W, b) with a tiled, pipelined Pallas matmul kernel.

    x: (*, in_features)  ->  (*, out_features), same dtype as x.
    """
    assert x.shape[-1] == params.in_features
    lead_shape = x.shape[:-1]
    out_dtype = x.dtype
    compute_dtype = params.wt.dtype

    x2 = x.reshape(-1, params.in_features)          # no dtype cast: tile-cast in-kernel
    m = x2.shape[0]
    k_pad, n_pad = params.wt.shape
    tk, tn = params.tk, params.tn

    # tm aligned to the sublane packing of the input/output dtype (8 f32 / 16 bf16 / 32 int8).
    align_m = max(_sublane_pack(x.dtype), _sublane_pack(out_dtype))
    tm_pref = _round_up(max(tm_pref, align_m), align_m)
    m_pad0 = _round_up(m, align_m)
    if m_pad0 <= tm_pref:
        tm, m_pad = m_pad0, m_pad0
    else:
        tm, m_pad = tm_pref, _round_up(m, tm_pref)

    # v7x has 2 TensorCores sharded over the "parallel" axes: make sure there are >= 2
    # parallel blocks when possible (no-op on v5e/v6e).
    if m_pad // tm == 1 and n_pad // tn == 1 and tn >= 256 and (tn // 2) % 128 == 0:
        tn = tn // 2

    # Pad x only when unavoidable (extra HBM pass otherwise skipped entirely).
    if (m_pad, k_pad) != (m, params.in_features):
        x2 = jnp.pad(x2, ((0, m_pad - m), (0, k_pad - params.in_features)))

    grid = (m_pad // tm, n_pad // tn, k_pad // tk)

    x_spec = pl.BlockSpec((tm, tk), lambda i, j, k: (i, k))
    if wt_buffers != 2:   # deepen the dominant (weight) stream if xprof shows exposed DMA
        wt_spec = pl.BlockSpec((tk, tn), lambda i, j, k: (k, j),
                               pipeline_mode=pl.Buffered(wt_buffers))
    else:
        wt_spec = pl.BlockSpec((tk, tn), lambda i, j, k: (k, j))
    b_spec = pl.BlockSpec((1, tn), lambda i, j, k: (0, j))
    out_spec = pl.BlockSpec((tm, tn), lambda i, j, k: (i, j))

    if out_dtype == jnp.float32:
        kernel = functools.partial(_silly_linear_kernel_f32out, compute_dtype=compute_dtype)
        scratch = []
    else:
        kernel = functools.partial(_silly_linear_kernel_acc, compute_dtype=compute_dtype)
        scratch = [pltpu.VMEM((tm, tn), jnp.float32)]

    x_bytes = m_pad * k_pad * jnp.dtype(x.dtype).itemsize
    w_bytes = k_pad * n_pad * jnp.dtype(compute_dtype).itemsize
    o_bytes = m_pad * n_pad * jnp.dtype(out_dtype).itemsize
    cost = pl.CostEstimate(
        flops=2 * m_pad * n_pad * k_pad,
        transcendentals=0,
        bytes_accessed=x_bytes + w_bytes + o_bytes + 4 * n_pad,
    )

    out_padded = pl.pallas_call(
        kernel,
        out_shape=jax.ShapeDtypeStruct((m_pad, n_pad), out_dtype),
        grid_spec=pltpu.PrefetchScalarGridSpec(
            num_scalar_prefetch=0,
            grid=grid,
            in_specs=[x_spec, wt_spec, b_spec],
            out_specs=out_spec,
            scratch_shapes=scratch,
        ),
        compiler_params=pltpu.CompilerParams(
            dimension_semantics=("parallel", "parallel", "arbitrary"),
        ),
        cost_estimate=cost,
    )(x2, params.wt, params.bias)

    out = out_padded[:m, :params.out_features]
    return out.reshape(*lead_shape, params.out_features)


# ----------------------- parameter setup (plain JAX) ------------------------ #
def make_silly_linear_params(in_features, out_features, int_dim, seed, dtype=jnp.float32):
    """Emulate RandumbTensor weights: weight = reshape(P_w @ weight_coef, (out, in)),
    bias = P_b @ bias_coef, with coef vectors initialized per SillyLinear.reset_parameters().
    """
    # TODO(synk): exact RandumbTensor basis-generation RNG (torch.Generator-seeded) is not
    # specified in the source; a deterministic Gaussian basis from jax.random stands in.
    basis_w = jax.random.normal(
        jax.random.PRNGKey(seed), (out_features * in_features, int_dim), dtype=dtype
    )
    basis_b = jax.random.normal(
        jax.random.PRNGKey(seed + 1), (out_features, int_dim), dtype=dtype
    )

    # reset_parameters(): kaiming-style bound for the coefficient vectors.
    a = math.sqrt(5.0)
    gain = math.sqrt(2.0 / (1.0 + a * a))        # calculate_gain('relu', sqrt(5))
    fan_in = float(in_features)
    out_std = gain / math.sqrt(fan_in)
    coef_bound = math.sqrt(3.0) * math.sqrt(3.0 / int_dim) * out_std
    bias_bound = math.sqrt(3.0) * math.sqrt(3.0 / int_dim) * out_std

    kcw, kcb = jax.random.split(jax.random.PRNGKey(seed + 12345))
    weight_coef = jax.random.uniform(
        kcw, (int_dim,), dtype=dtype, minval=-coef_bound, maxval=coef_bound
    )
    bias_coef = jax.random.uniform(
        kcb, (int_dim,), dtype=dtype, minval=-bias_bound, maxval=bias_bound
    )

    weight = (basis_w @ weight_coef).reshape(out_features, in_features)  # (out, in)
    bias = basis_b @ bias_coef                                           # (out,)
    return weight, bias


# ---------------------------------- main ------------------------------------ #
if __name__ == "__main__":
    in_features, out_features, int_dim, seed = 32, 48, 8, 0
    batch, seq = 2, 8

    key = jax.random.PRNGKey(0)
    x = jax.random.normal(key, (batch, seq, in_features), dtype=jnp.float32)
    weight, bias = make_silly_linear_params(in_features, out_features, int_dim, seed)
    y_ref = x @ weight.T + bias

    # --- default path: bf16 weights / compute, f32 MXU accumulation, f32 output ------
    params = prepare_silly_linear_params(weight, bias)          # compute_dtype=bf16 default
    y = jax.block_until_ready(silly_linear_forward(x, params))
    assert y.shape == (batch, seq, out_features)
    assert jnp.allclose(y, y_ref, atol=2e-2, rtol=2e-2)

    # --- explicit f32 weight path (direct-accumulate-into-output variant) ------------
    params_f32 = prepare_silly_linear_params(weight, bias, compute_dtype=jnp.float32)
    y_f32 = jax.block_until_ready(silly_linear_forward(x, params_f32))
    assert jnp.allclose(y_f32, y_ref, atol=5e-3, rtol=5e-3)

    # --- bf16 input/output (scratch-accumulator variant) + v7x 2-block split path ----
    in2, out2 = 256, 256
    w2, b2 = make_silly_linear_params(in2, out2, int_dim, seed=3)
    x_big = jax.random.normal(jax.random.PRNGKey(1), (4, 8, in2), dtype=jnp.float32)
    y2_ref = x_big @ w2.T + b2

    params2 = prepare_silly_linear_params(w2, b2)                # bf16, default tile prefs
    x_bf16 = x_big.astype(jnp.bfloat16)
    y2 = jax.block_until_ready(silly_linear_forward(x_bf16, params2))
    assert y2.shape == (4, 8, out2) and y2.dtype == jnp.bfloat16
    assert jnp.allclose(y2.astype(jnp.float32), y2_ref, atol=6e-2, rtol=6e-2)

    # --- multi-tile grid: multiple M/N/K blocks, K accumulation + init/finalize ------
    params3 = prepare_silly_linear_params(w2, b2, tn_pref=128, tk_pref=128)
    y3 = jax.block_until_ready(silly_linear_forward(x_big, params3, tm_pref=16))
    assert y3.shape == (4, 8, out2)
    assert jnp.allclose(y3, y2_ref, atol=2e-2, rtol=2e-2)

    print("KERNEL_OK")
</pallas_src>

<mosaic_0001>
module attributes {stable_mosaic.version = 11 : i64} {
  func.func @_silly_linear_kernel_f32out(%arg0: i32, %arg1: i32, %arg2: i32, %arg3: memref<16x128xf32, #tpu.memory_space<vmem>>, %arg4: memref<128x128xbf16, #tpu.memory_space<vmem>>, %arg5: memref<1x128xf32, #tpu.memory_space<vmem>>, %arg6: memref<16x128xf32, #tpu.memory_space<vmem>>) attributes {dimension_semantics = [#tpu.dimension_semantics<parallel>, #tpu.dimension_semantics<parallel>, #tpu.dimension_semantics<arbitrary>], iteration_bounds = array<i64: 1, 1, 1>, scalar_prefetch = 0 : i64, scratch_operands = 0 : i64, tpu.core_type = #tpu.core_type<tc>, window_params = [{transform_indices = @transform_0, window_bounds = array<i64: 16, 128>}, {transform_indices = @transform_1, window_bounds = array<i64: 128, 128>}, {transform_indices = @transform_2, window_bounds = array<i64: 1, 128>}, {transform_indices = @transform_3, window_bounds = array<i64: 16, 128>}]} {
    %c0_i32 = arith.constant 0 : i32
    %0 = arith.cmpi eq, %arg2, %c0_i32 : i32
    %1 = arith.extui %0 : i1 to i32
    %c0_i32_0 = arith.constant 0 : i32
    %2 = arith.cmpi ne, %1, %c0_i32_0 : i32
    scf.if %2 {
      %cst_10 = arith.constant 0.000000e+00 : f32
      %13 = vector.broadcast %cst_10 : f32 to vector<16x128xf32>
      %c0_11 = arith.constant 0 : index
      %c0_12 = arith.constant 0 : index
      %14 = vector.load %arg6[%c0_11, %c0_12] : memref<16x128xf32, #tpu.memory_space<vmem>>, vector<16x128xf32>
      tpu.vector_store %arg6[%c0_11, %c0_12], %13 {strides = array<i32>} : memref<16x128xf32, #tpu.memory_space<vmem>>, vector<16x128xf32>,
    } else {
    }
    %c0 = arith.constant 0 : index
    %c0_1 = arith.constant 0 : index
    %3 = vector.load %arg6[%c0, %c0_1] : memref<16x128xf32, #tpu.memory_space<vmem>>, vector<16x128xf32>
    %c0_2 = arith.constant 0 : index
    %c0_3 = arith.constant 0 : index
    %4 = vector.load %arg3[%c0_2, %c0_3] : memref<16x128xf32, #tpu.memory_space<vmem>>, vector<16x128xf32>
    %5 = arith.truncf %4 : vector<16x128xf32> to vector<16x128xbf16>
    %c0_4 = arith.constant 0 : index
    %c0_5 = arith.constant 0 : index
    %6 = vector.load %arg4[%c0_4, %c0_5] : memref<128x128xbf16, #tpu.memory_space<vmem>>, vector<128x128xbf16>
    %cst = arith.constant dense<0.000000e+00> : vector<16x128xf32>
    %7 = tpu.matmul %5, %6, %cst {dimension_numbers = #tpu.dot_dimension_numbers<[1], [0], [0], [1], [0, 0, 1, 1], [], []>} : vector<16x128xbf16>, vector<128x128xbf16>, vector<16x128xf32> -> vector<16x128xf32>
    %8 = arith.addf %3, %7 : vector<16x128xf32>
    %c0_6 = arith.constant 0 : index
    %c0_7 = arith.constant 0 : index
    %9 = vector.load %arg6[%c0_6, %c0_7] : memref<16x128xf32, #tpu.memory_space<vmem>>, vector<16x128xf32>
    tpu.vector_store %arg6[%c0_6, %c0_7], %8 {strides = array<i32>} : memref<16x128xf32, #tpu.memory_space<vmem>>, vector<16x128xf32>,
    %c0_i32_8 = arith.constant 0 : i32
    %10 = arith.cmpi eq, %arg2, %c0_i32_8 : i32
    %11 = arith.extui %10 : i1 to i32
    %c0_i32_9 = arith.constant 0 : i32
    %12 = arith.cmpi ne, %11, %c0_i32_9 : i32
    scf.if %12 {
      %c0_10 = arith.constant 0 : index
      %c0_11 = arith.constant 0 : index
      %13 = vector.load %arg6[%c0_10, %c0_11] : memref<16x128xf32, #tpu.memory_space<vmem>>, vector<16x128xf32>
      %c0_12 = arith.constant 0 : index
      %c0_13 = arith.constant 0 : index
      %14 = vector.load %arg5[%c0_12, %c0_13] : memref<1x128xf32, #tpu.memory_space<vmem>>, vector<1x128xf32>
      %15 = vector.broadcast %14 : vector<1x128xf32> to vector<16x128xf32>
      %16 = arith.addf %13, %15 : vector<16x128xf32>
      %c0_14 = arith.constant 0 : index
      %c0_15 = arith.constant 0 : index
      %17 = vector.load %arg6[%c0_14, %c0_15] : memref<16x128xf32, #tpu.memory_space<vmem>>, vector<16x128xf32>
      tpu.vector_store %arg6[%c0_14, %c0_15], %16 {strides = array<i32>} : memref<16x128xf32, #tpu.memory_space<vmem>>, vector<16x128xf32>,
    } else {
    }
    return
  }
  func.func @transform_0(%arg0: i32, %arg1: i32, %arg2: i32) -> (i32, i32) {
    %c0_i32 = arith.constant 0 : i32
    return %arg0, %arg2 : i32, i32
  }
  func.func @transform_1(%arg0: i32, %arg1: i32, %arg2: i32) -> (i32, i32) {
    %c0_i32 = arith.constant 0 : i32
    return %arg2, %arg1 : i32, i32
  }
  func.func @transform_2(%arg0: i32, %arg1: i32, %arg2: i32) -> (i32, i32) {
    %c0_i32 = arith.constant 0 : i32
    %c0_i32_0 = arith.constant 0 : i32
    return %c0_i32, %arg1 : i32, i32
  }
  func.func @transform_3(%arg0: i32, %arg1: i32, %arg2: i32) -> (i32, i32) {
    %c0_i32 = arith.constant 0 : i32
    return %arg0, %arg1 : i32, i32
  }
}

</mosaic_0001>

<bundles_post_ra>
// kernel: tpu_custom_call.1
= control target key start
LH: loop header
LB: loop body
LE: loop exit
PB: predicated region body
PF: predicated region fallthrough
CT: control target
= control target key end

     0   :  { %8 = vsyncpa [#allocation3], 0  ;;  %s399_s0 = inlined_call_operand.hbm [shape: f32[16,128], index: 0, kind: input, shape index: {}]   ;;  %s400_s1 = inlined_call_operand.hbm [shape: bf16[128,128], index: 1, kind: input, shape index: {}]   ;;  %s401_s2 = inlined_call_operand.vmem [shape: f32[1,128], index: 2, kind: input, shape index: {}]   ;;  %s402_s3 = inlined_call_operand.hbm [shape: f32[16,128], index: 3, kind: output, shape index: {}]  }
   0x1   :  { %9 = vsyncpa [#allocation6], 0 }
   0x2   :  { %10 = vsyncpa [#allocation4], 0  ;;  %s325_s12 = smov [#allocation2]   ;;  %s253_s16 = scalar_lea.hbm %s399_s0, 256 }
   0x3   :  { %s16_s13 = sshll.u32 %s325_s12, 4  ;;  %p254_p0 = scmp.ne.s32.totalorder %s399_s0, %s253_s16  ;;  %s17_s13 = int_to_ptr.vmem [resolvable:$true] %s16_s13 }
   0x4   :  { %p257_p1 = scmp.lt.u32.totalorder %s253_s16, %s399_s0 }
   0x6   :  { %p259_p2 = pnand %p257_p1, %p254_p0 }
   0x8   :  { %262 = shalt.err (!%p259_p2)
}
   0x9   :  { %s263_s21 = scalar_lea.vmem %s17_s13, 256  ;;  %p268_p4 = scmp.lt.s32.totalorder %s17_s13, %s17_s13 }
   0xa   :  { %p264_p3 = scmp.ne.s32.totalorder %s17_s13, %s263_s21  ;;  %p269_p5 = scmp.lt.s32.totalorder %s263_s21, %s263_s21 }
   0xc   :  { %p270_p6 = por %p269_p5, %p268_p4 }
   0xe   :  { %p271_p7 = pnand %p270_p6, %p264_p3 }
  0x10   :  { %274 = shalt.err (!%p271_p7)
}
  0x11   :  { %s326_s22 = smov 128   ;;  %s327_s23 = smov 8  }
  0x12   :  { %22 = dma.hbm_to_vmem [thread:$0]  %s399_s0, 256, %s17_s13, [#allocation3], %s326_s22, %s326_s22, %s327_s23  }
  0x13   :  { %s328_s26 = smov [#allocation5]   ;;  %s275_s30 = scalar_lea.hbm %s400_s1, 1024 }
  0x14   :  { %s28_s27 = sshll.u32 %s328_s26, 4  ;;  %p276_p8 = scmp.ne.s32.totalorder %s400_s1, %s275_s30  ;;  %s29_s27 = int_to_ptr.vmem [resolvable:$true] %s28_s27 }
  0x15   :  { %p279_p9 = scmp.lt.u32.totalorder %s275_s30, %s400_s1 }
  0x17   :  { %p281_p10 = pnand %p279_p9, %p276_p8 }
  0x19   :  { %284 = shalt.err (!%p281_p10)
}
  0x1a   :  { %s285_s8 = scalar_lea.vmem %s29_s27, 1024  ;;  %p290_p12 = scmp.lt.s32.totalorder %s29_s27, %s29_s27 }
  0x1b   :  { %p286_p11 = scmp.ne.s32.totalorder %s29_s27, %s285_s8  ;;  %p291_p13 = scmp.lt.s32.totalorder %s285_s8, %s285_s8 }
  0x1d   :  { %p292_p0 = por %p291_p13, %p290_p12 }
  0x1f   :  { %p293_p1 = pnand %p292_p0, %p286_p11 }
  0x21   :  { %296 = shalt.err (!%p293_p1)
}
  0x22   :  { %s329_s0 = smov 64   ;;  %s330_s9 = smov 4  }
  0x23   :  { %34 = dma.hbm_to_vmem [thread:$0]  %s400_s1, 1024, %s29_s27, [#allocation6], %s329_s0, %s329_s0, %s330_s9  }
  0x24   :  { %319 = dma.done.wait [#allocation3], 256  }
  0x25   :  { %320 = vsyncadd [#allocation3], 4294967040 }
  0x26   :  { %321 = dma.done.wait [#allocation6], 1024  }
  0x27   :  { %322 = vsyncadd [#allocation6], 4294966272  ;;  %v331_v0 = vmov 0.0   ;;  %vm332_vm0 = vmmov 0   ;;  %v245_v1 = vld [vmem:[#allocation5] sm:$0xff]   ;;  %v246_v2 = vld [vmem:[#allocation5 + $0x8] sm:$0xff]  }
  0x28   :  { %216 = vmatprep.subr.bf16.mxu0 %v331_v0  ;;  %232 = vmatprep.mubr.msk.bf16.mxu0 %vm332_vm0, %v331_v0  ;;  %v247_v3 = vld [vmem:[#allocation5 + $0x10] sm:$0xff]   ;;  %v248_v4 = vld [vmem:[#allocation5 + $0x18] sm:$0xff]   ;;  %v249_v5 = vld [vmem:[#allocation5 + $0x20] sm:$0xff]   ;;  %s333_s13 = smov [#allocation7]  }
  0x29   :  { %217 = vmatpush3.bf16.msra.mxu0 %v245_v1  ;;  %v250_v6 = vld [vmem:[#allocation5 + $0x28] sm:$0xff]   ;;  %v251_v7 = vld [vmem:[#allocation5 + $0x30] sm:$0xff]   ;;  %v252_v8 = vld [vmem:[#allocation5 + $0x38] sm:$0xff]   ;;  %s185_s14 = sshll.u32 %s333_s13, 4  ;;  %s186_s14 = int_to_ptr.vmem [resolvable:$true] %s185_s14 }
  0x2a   :  { %218 = vmatprep.subr.bf16.mxu0 %v331_v0  ;;  %v52_v9 = vld [vmem:[#allocation2] sm:$0xff]  ;;  %v53_v10 = vld [vmem:[#allocation2 + $0x8] sm:$0xff]  ;;  %s297_s15 = scalar_lea.vmem %s186_s14, 256  ;;  %p302_p3 = scmp.lt.s32.totalorder %s186_s14, %s186_s14 }
  0x2b   :  { %v54_v11 = vpack.c.bf16 %v53_v10, %v52_v9  ;;  %v206_v13 = vld [vmem:[%s401_s2] ss:$0 sm:$0xff]  ;;  %p298_p2 = scmp.ne.s32.totalorder %s186_s14, %s297_s15  ;;  %p303_p4 = scmp.lt.s32.totalorder %s297_s15, %s297_s15 }
  0x2d   :  { %219 = vmatpush3.bf16.msra.mxu0 %v246_v2  ;;  %p304_p5 = por %p303_p4, %p302_p3 }
  0x2e   :  { %220 = vmatprep.subr.bf16.mxu0 %v331_v0 }
  0x2f   :  { %p305_p6 = pnand %p304_p5, %p298_p2 }
  0x31   :  { %221 = vmatpush3.bf16.msra.mxu0 %v247_v3 }
  0x32   :  { %222 = vmatprep.subr.bf16.mxu0 %v331_v0 }
  0x35   :  { %223 = vmatpush3.bf16.msra.mxu0 %v248_v4 }
  0x36   :  { %224 = vmatprep.subr.bf16.mxu0 %v331_v0 }
  0x39   :  { %225 = vmatpush3.bf16.msra.mxu0 %v249_v5 }
  0x3a   :  { %226 = vmatprep.subr.bf16.mxu0 %v331_v0 }
  0x3d   :  { %227 = vmatpush3.bf16.msra.mxu0 %v250_v6 }
  0x3e   :  { %228 = vmatprep.subr.bf16.mxu0 %v331_v0 }
  0x41   :  { %229 = vmatpush3.bf16.msra.mxu0 %v251_v7 }
  0x42   :  { %230 = vmatprep.subr.bf16.mxu0 %v331_v0 }
  0x45   :  { %231 = vmatpush3.bf16.msra.mxu0 %v252_v8 }
  0x48   :  { %233 = vmatmul.mubr.bf16.vlgmr.msra.gmra.mrb[0].mxu0 %v54_v11 }
 0x11b   :  { %v153_v12 = vpop.f32.mrb[0].mxu0 }
 0x11c   :  { %v234_v14 = vpop.f32.mrb[1].mxu0  ;;  %v176_v17 = vadd.f32 %v206_v13, %v153_v12 }
 0x11d   :  { %v156_v15 = vpop.f32.mrb[2].mxu0 }
 0x11e   :  { %v235_v16 = vpop.f32.mrb[3].mxu0  ;;  %v177_v18 = vadd.f32 %v206_v13, %v156_v15  ;;  %178 = vst [vmem:[#allocation7] sm:$0xff] %v176_v17 }
 0x120   :  { %179 = vst [vmem:[#allocation7 + $0x8] sm:$0xff] %v177_v18 }
 0x121   :  { %308 = shalt.err (!%p305_p6)
}
 0x122   :  { %s309_s2 = scalar_lea.hbm %s402_s3, 256 }
 0x123   :  { %p310_p7 = scmp.ne.s32.totalorder %s402_s3, %s309_s2  ;;  %p313_p8 = scmp.lt.u32.totalorder %s309_s2, %s402_s3 }
 0x125   :  { %p315_p9 = pnand %p313_p8, %p310_p7 }
 0x127   :  { %318 = shalt.err (!%p315_p9)
}
 0x128   :  { %191 = dma.vmem_to_hbm [thread:$0]  %s186_s14, 256, %s402_s3, [#allocation4], %s326_s22, %s326_s22, %s327_s23  }
 0x129   :  { %323 = dma.done.wait [#allocation4], 256  }
 0x12a   :  { %324 = vsyncadd [#allocation4], 4294967040 }
 0x12b   :  { %195 = vsyncpa [#allocation3], 1 }
 0x12c   :  { %196 = vsyncpa [#allocation6], 1 }
 0x12d   :  { %197 = vsyncpa [#allocation4], 1 }

</bundles_post_ra>
